<compile_context>
chip_gen: v7x
topology: tpu7x:2x2x1
jax: 0.10.0
libtpu: 0.0.40
codegen_flags: <defaults>
</compile_context>

<pallas_src>
import functools

import jax
import jax.numpy as jnp
from jax import lax
from jax.experimental import pallas as pl
from jax.experimental.pallas import tpu as pltpu


def _converter_kernel(z_ref, w_ref, b_ref, s_ref, base_ref, out_ref, *, ic):
    z = z_ref[...]                                           # (TB, C) f32
    c = z.shape[1]

    # Clamp only the hidden lanes (lane >= IC): one VPU select, no lane slicing.
    lane = lax.broadcasted_iota(jnp.int32, (1, c), 1)
    zc = jnp.where(lane >= ic, jnp.clip(z, -1.0, 1.0), z)    # (TB, C)

    # model(x, h) = tanh([x | h] @ [Wx; Wh] + b): one fused MXU matmul, K = C = IC + HC.
    model_out = jnp.tanh(
        jnp.dot(zc, w_ref[...], preferred_element_type=jnp.float32)
        + b_ref[...]                                         # (1, HC) broadcast add
    )                                                        # (TB, HC)

    # Lane scatter into the flattened (C*IC)-wide slab via a constant 0/1 matrix on the
    # (idle) MXU, plus the constant identity-base row (non-overlapping lanes -> exact).
    out_ref[...] = (
        jnp.dot(model_out, s_ref[...], preferred_element_type=jnp.float32)
        + base_ref[...]                                      # (1, C*IC) broadcast add
    ).astype(out_ref.dtype)


def _round_up(x, m):
    return -(-x // m) * m


_TILE_CANDIDATES = (8192, 4096, 2048, 1024, 512, 256, 128, 64, 32, 16, 8)


def _pick_tile(B, requested):
    """Batch rows per grid step (sublane dim of both the z and out tiles)."""
    if requested is not None:
        tb = int(requested)
        assert tb == B or tb % 8 == 0, (
            "tile_b must be a multiple of 8 (sublane constraint) unless tile_b == B")
        return tb
    if B <= 8:
        return B                       # single full-extent block (== full array dim)
    # Largest candidate <= round_up(ceil(B/2), 8): keeps the per-step output slab as large
    # as possible (amortizes the ~0.35 us/step grid overhead) while guaranteeing >= 2 grid
    # steps so the "parallel" batch axis pipelines and shards across TensorCores on
    # multi-TC parts (v7x).  The tail block, if any, is OOB-masked by Pallas.
    target = _round_up(pl.cdiv(B, 2), 8)
    for cand in _TILE_CANDIDATES:
        if cand <= target:
            return cand
    return 8


def continuous_rnn_converter(z, wx, wh, b, *, input_channels, hidden_channels,
                             tile_b=None):
    """z: (B, IC+HC) float32 -> (B, IC+HC, IC) float32."""
    B, C = z.shape
    ic, hc = input_channels, hidden_channels
    assert C == ic + hc
    flat = C * ic
    tb = _pick_tile(B, tile_b)
    grid = (pl.cdiv(B, tb),)           # non-divisible B: last block is masked by Pallas

    # Fused MLP weight (C, HC) and bias (1, HC).
    w = jnp.concatenate([wx, wh], axis=0).astype(jnp.float32)
    b2 = b.reshape(1, hc).astype(jnp.float32)

    # Constant scatter matrix: S[k, (ic+k)*ic] = 1 places model_out[:, k] at the flattened
    # position of (row = ic+k, col = 0).
    s = (
        jnp.zeros((hc, flat), jnp.float32)
        .at[jnp.arange(hc), (ic + jnp.arange(hc)) * ic]
        .set(1.0)
    )
    # Constant flattened out_base row: identity in the top IC rows (lanes r*ic + r).
    base_flat = (
        jnp.zeros((flat,), jnp.float32)
        .at[jnp.arange(ic) * ic + jnp.arange(ic)]
        .set(1.0)
        .reshape(1, flat)
    )

    kernel = functools.partial(_converter_kernel, ic=ic)

    # VMEM budget with *padded* tiles: z tile lanes C -> mult of 128, out tile 144 -> 256
    # lanes; double-buffered inputs/outputs plus the (tiny, also padded) resident constants.
    lanes_in = _round_up(C, 128)
    lanes_out = _round_up(flat, 128)
    sub_tb = _round_up(tb, 8)
    tile_bytes = 4 * sub_tb * (lanes_in + lanes_out)
    const_bytes = 4 * (
        _round_up(C, 8) * _round_up(hc, 128)     # fused W
        + 8 * _round_up(hc, 128)                 # bias row
        + _round_up(hc, 8) * lanes_out           # scatter matrix
        + 8 * lanes_out                          # base row
    )
    budget = 2 * (tile_bytes + const_bytes) + (2 << 20)      # double-buffered + headroom
    vmem_limit = min(48 << 20, max(32 << 20, budget))        # <= v7x's 64 MiB physical VMEM

    cost = pl.CostEstimate(
        flops=2 * B * C * hc + 2 * B * hc * flat,
        transcendentals=B * hc,
        bytes_accessed=4 * (B * C + B * flat + C * hc + hc + hc * flat + flat),
    )

    out_flat = pl.pallas_call(
        kernel,
        out_shape=jax.ShapeDtypeStruct((B, flat), jnp.float32),
        grid_spec=pltpu.PrefetchScalarGridSpec(
            num_scalar_prefetch=0,
            grid=grid,
            in_specs=[
                pl.BlockSpec((tb, C), lambda i: (i, 0)),      # z tile
                pl.BlockSpec((C, hc), lambda i: (0, 0)),      # fused W (resident)
                pl.BlockSpec((1, hc), lambda i: (0, 0)),      # bias row (resident)
                pl.BlockSpec((hc, flat), lambda i: (0, 0)),   # scatter matrix (resident)
                pl.BlockSpec((1, flat), lambda i: (0, 0)),    # identity base row (resident)
            ],
            out_specs=pl.BlockSpec((tb, flat), lambda i: (i, 0)),
        ),
        compiler_params=pltpu.CompilerParams(
            dimension_semantics=("parallel",),
            vmem_limit_bytes=vmem_limit,
        ),
        cost_estimate=cost,
    )(z, w, b2, s, base_flat)

    # Row-major relabel only: out[b, r, c] == out_flat[b, r*IC + c].
    return out_flat.reshape(B, C, ic)


def reference(z, wx, wh, b, *, input_channels, hidden_channels):
    ic = input_channels
    x = z[..., :ic]
    h = jnp.clip(z[..., ic:], -1.0, 1.0)
    model_out = jnp.tanh(x @ wx + h @ wh + b)
    B = z.shape[0]
    c = ic + hidden_channels
    base = jnp.zeros((c, ic), jnp.float32).at[jnp.arange(ic), jnp.arange(ic)].set(1.0)
    out = jnp.broadcast_to(base[None], (B, c, ic))
    out = out.at[:, ic:, 0].set(model_out)
    return out


if __name__ == "__main__":
    IC, HC, B = 4, 32, 8

    key = jax.random.PRNGKey(0)
    kz, kwx, kwh, kb = jax.random.split(key, 4)
    z = jax.random.normal(kz, (B, IC + HC), dtype=jnp.float32)
    wx = 0.1 * jax.random.normal(kwx, (IC, HC), dtype=jnp.float32)
    wh = 0.1 * jax.random.normal(kwh, (HC, HC), dtype=jnp.float32)
    b = 0.1 * jax.random.normal(kb, (HC,), dtype=jnp.float32)

    out = continuous_rnn_converter(
        z, wx, wh, b, input_channels=IC, hidden_channels=HC
    )
    out = jax.block_until_ready(out)

    ref = reference(z, wx, wh, b, input_channels=IC, hidden_channels=HC)
    assert out.shape == (B, IC + HC, IC)
    assert jnp.allclose(out, ref, atol=1e-5, rtol=1e-5), "mismatch vs reference"

    print("KERNEL_OK")
</pallas_src>

<mosaic_0001>
module attributes {stable_mosaic.version = 11 : i64} {
  func.func @_converter_kernel(%arg0: i32, %arg1: memref<8x36xf32, #tpu.memory_space<vmem>>, %arg2: memref<36x32xf32, #tpu.memory_space<vmem>>, %arg3: memref<1x32xf32, #tpu.memory_space<vmem>>, %arg4: memref<32x144xf32, #tpu.memory_space<vmem>>, %arg5: memref<1x144xf32, #tpu.memory_space<vmem>>, %arg6: memref<8x144xf32, #tpu.memory_space<vmem>>) attributes {dimension_semantics = [#tpu.dimension_semantics<parallel>], iteration_bounds = array<i64: 1>, scalar_prefetch = 0 : i64, scratch_operands = 0 : i64, tpu.core_type = #tpu.core_type<tc>, window_params = [{transform_indices = @transform_0, window_bounds = array<i64: 8, 36>}, {pipeline_mode = #tpu.pipeline_mode<synchronous>, transform_indices = @transform_1, window_bounds = array<i64: 36, 32>}, {pipeline_mode = #tpu.pipeline_mode<synchronous>, transform_indices = @transform_2, window_bounds = array<i64: 1, 32>}, {pipeline_mode = #tpu.pipeline_mode<synchronous>, transform_indices = @transform_3, window_bounds = array<i64: 32, 144>}, {pipeline_mode = #tpu.pipeline_mode<synchronous>, transform_indices = @transform_4, window_bounds = array<i64: 1, 144>}, {transform_indices = @transform_5, window_bounds = array<i64: 8, 144>}]} {
    %c0 = arith.constant 0 : index
    %c0_0 = arith.constant 0 : index
    %0 = vector.load %arg1[%c0, %c0_0] : memref<8x36xf32, #tpu.memory_space<vmem>>, vector<8x36xf32>
    %1 = tpu.iota {dimensions = array<i32: 1>} : vector<1x36xi32>
    %c4_i32 = arith.constant 4 : i32
    %2 = vector.broadcast %c4_i32 : i32 to vector<1x36xi32>
    %3 = arith.cmpi sge, %1, %2 : vector<1x36xi32>
    %cst = arith.constant -1.000000e+00 : f32
    %cst_1 = arith.constant 1.000000e+00 : f32
    %4 = vector.broadcast %cst : f32 to vector<8x36xf32>
    %5 = arith.maximumf %4, %0 : vector<8x36xf32>
    %6 = vector.broadcast %cst_1 : f32 to vector<8x36xf32>
    %7 = arith.minimumf %6, %5 : vector<8x36xf32>
    %8 = vector.shape_cast %3 : vector<1x36xi1> to vector<1x36xi1>
    %9 = vector.broadcast %8 : vector<1x36xi1> to vector<8x36xi1>
    %10 = arith.select %9, %7, %0 : vector<8x36xi1>, vector<8x36xf32>
    %c0_2 = arith.constant 0 : index
    %c0_3 = arith.constant 0 : index
    %11 = vector.load %arg2[%c0_2, %c0_3] : memref<36x32xf32, #tpu.memory_space<vmem>>, vector<36x32xf32>
    %cst_4 = arith.constant dense<0.000000e+00> : vector<8x32xf32>
    %12 = tpu.matmul %10, %11, %cst_4 {dimension_numbers = #tpu.dot_dimension_numbers<[1], [0], [0], [1], [0, 0, 1, 1], [], []>} : vector<8x36xf32>, vector<36x32xf32>, vector<8x32xf32> -> vector<8x32xf32>
    %c0_5 = arith.constant 0 : index
    %c0_6 = arith.constant 0 : index
    %13 = vector.load %arg3[%c0_5, %c0_6] : memref<1x32xf32, #tpu.memory_space<vmem>>, vector<1x32xf32>
    %14 = vector.broadcast %13 : vector<1x32xf32> to vector<8x32xf32>
    %15 = arith.addf %12, %14 : vector<8x32xf32>
    %16 = math.tanh %15 : vector<8x32xf32>
    %c0_7 = arith.constant 0 : index
    %c0_8 = arith.constant 0 : index
    %17 = vector.load %arg4[%c0_7, %c0_8] : memref<32x144xf32, #tpu.memory_space<vmem>>, vector<32x144xf32>
    %cst_9 = arith.constant dense<0.000000e+00> : vector<8x144xf32>
    %18 = tpu.matmul %16, %17, %cst_9 {dimension_numbers = #tpu.dot_dimension_numbers<[1], [0], [0], [1], [0, 0, 1, 1], [], []>} : vector<8x32xf32>, vector<32x144xf32>, vector<8x144xf32> -> vector<8x144xf32>
    %c0_10 = arith.constant 0 : index
    %c0_11 = arith.constant 0 : index
    %19 = vector.load %arg5[%c0_10, %c0_11] : memref<1x144xf32, #tpu.memory_space<vmem>>, vector<1x144xf32>
    %20 = vector.broadcast %19 : vector<1x144xf32> to vector<8x144xf32>
    %21 = arith.addf %18, %20 : vector<8x144xf32>
    %c0_12 = arith.constant 0 : index
    %c0_13 = arith.constant 0 : index
    %22 = vector.load %arg6[%c0_12, %c0_13] : memref<8x144xf32, #tpu.memory_space<vmem>>, vector<8x144xf32>
    tpu.vector_store %arg6[%c0_12, %c0_13], %21 {strides = array<i32>} : memref<8x144xf32, #tpu.memory_space<vmem>>, vector<8x144xf32>,
    return
  }
  func.func @transform_0(%arg0: i32) -> (i32, i32) {
    %c0_i32 = arith.constant 0 : i32
    %c0_i32_0 = arith.constant 0 : i32
    return %arg0, %c0_i32 : i32, i32
  }
  func.func @transform_1(%arg0: i32) -> (i32, i32) {
    %c0_i32 = arith.constant 0 : i32
    %c0_i32_0 = arith.constant 0 : i32
    %c0_i32_1 = arith.constant 0 : i32
    return %c0_i32, %c0_i32_0 : i32, i32
  }
  func.func @transform_2(%arg0: i32) -> (i32, i32) {
    %c0_i32 = arith.constant 0 : i32
    %c0_i32_0 = arith.constant 0 : i32
    %c0_i32_1 = arith.constant 0 : i32
    return %c0_i32, %c0_i32_0 : i32, i32
  }
  func.func @transform_3(%arg0: i32) -> (i32, i32) {
    %c0_i32 = arith.constant 0 : i32
    %c0_i32_0 = arith.constant 0 : i32
    %c0_i32_1 = arith.constant 0 : i32
    return %c0_i32, %c0_i32_0 : i32, i32
  }
  func.func @transform_4(%arg0: i32) -> (i32, i32) {
    %c0_i32 = arith.constant 0 : i32
    %c0_i32_0 = arith.constant 0 : i32
    %c0_i32_1 = arith.constant 0 : i32
    return %c0_i32, %c0_i32_0 : i32, i32
  }
  func.func @transform_5(%arg0: i32) -> (i32, i32) {
    %c0_i32 = arith.constant 0 : i32
    %c0_i32_0 = arith.constant 0 : i32
    return %arg0, %c0_i32 : i32, i32
  }
}

</mosaic_0001>

<bundles_post_ra>
// kernel: tpu_custom_call.1
= control target key start
LH: loop header
LB: loop body
LE: loop exit
PB: predicated region body
PF: predicated region fallthrough
CT: control target
= control target key end

     0   :  { %v22_v3 = vlaneseq  ;;  %v301_v4 = vmov 0.0|0.0   ;;  %v302_v7 = vmov 0.0   ;;  %vm303_vm0 = vmmov 0   ;;  %s395_s0 = inlined_call_operand.vmem [shape: f32[8,36], index: 0, kind: input, shape index: {}]   ;;  %s396_s1 = inlined_call_operand.vmem [shape: f32[36,32], index: 1, kind: input, shape index: {}]   ;;  %s397_s2 = inlined_call_operand.vmem [shape: f32[1,32], index: 2, kind: input, shape index: {}]   ;;  %s398_s3 = inlined_call_operand.vmem [shape: f32[32,144], index: 3, kind: input, shape index: {}]   ;;  %s399_s4 = inlined_call_operand.vmem [shape: f32[1,144], index: 4, kind: input, shape index: {}]   ;;  %s400_s5 = inlined_call_operand.hbm [shape: f32[8,144], index: 5, kind: output, shape index: {}]  }
   0x1   :  { %v30_v0 = vld [vmem:[%s396_s1] sm:$0xff]  ;;  %v31_v1 = vld [vmem:[%s396_s1 + $0x8] sm:$0xff]  ;;  %v32_v2 = vld [vmem:[%s396_s1 + $0x10] sm:$0xff]  ;;  %257 = vmatprep.subr.bf16.mxu0 %v301_v4  ;;  %209 = vmatprep.mubr.f32.mxu1 %v302_v7 }
   0x2   :  { %v258_v5 = vpack.c.bf16 %v31_v1, %v30_v0  ;;  %v33_v6 = vld [vmem:[%s396_s1 + $0x18] sm:$0xff]  ;;  %254 = vmatprep.mubr.msk.f32.mxu0 %vm303_vm0, %v302_v7  ;;  %v21_v8 = vld [vmem:[%s395_s0] sm:$0xff]  ;;  %v23_v9 = vand.u32 127, %v22_v3 }
   0x3   :  { %10 = vsyncpa [#allocation3], 0  ;;  %v261_v10 = vpack.c.bf16 %v33_v6, %v32_v2  ;;  %v233_v11 = vclamps-f32 %v21_v8, 1.0  ;;  %v34_v12 = vld [vmem:[%s396_s1 + $0x20] sm:$0xf]  ;;  %vm46_vm2 = vcmask 1043456  }
   0x4   :  { %259 = vmatpush3.bf16.msra.mxu0 %v258_v5  ;;  %vm24_vm1 = vcmp.ge.s32.totalorder %v23_v9, 4  ;;  %vm42_vm3 = vcmask 293888   ;;  %v122_v14 = vld [vmem:[%s398_s3 + $0x8] sm:$0xff]  ;;  %v124_v15 = vld [vmem:[%s398_s3 + $0x18] sm:$0xff]  ;;  %v121_v16 = vld [vmem:[%s398_s3] sm:$0xff]  ;;  %vm141_vm4 = vcmask 261120  }
   0x5   :  { %260 = vmatprep.subr.bf16.mxu0 %v301_v4  ;;  %v29_v13 = vsel %vm24_vm1, %v233_v11, %v21_v8  ;;  %v263_v17 = vpack.c.bf16 %v124_v15, %v122_v14  ;;  %v123_v18 = vld [vmem:[%s398_s3 + $0x10] sm:$0xff]  ;;  %v126_v19 = vld [vmem:[%s398_s3 + $0x28] sm:$0xff]  ;;  %v128_v20 = vld [vmem:[%s398_s3 + $0x38] sm:$0xff]  ;;  %v132_v31 = vshrl.u32 %v22_v3, 7  ;;  %s304_s22 = smov [#allocation2]   ;;  %vm217_vm5 = vcmask 130048  }
   0x6   :  { %v265_v21 = vpack.c.bf16 %v123_v18, %v121_v16  ;;  %v267_v22 = vpack.c.bf16 %v128_v20, %v126_v19  ;;  %v125_v23 = vld [vmem:[%s398_s3 + $0x20] sm:$0xff]  ;;  %v127_v24 = vld [vmem:[%s398_s3 + $0x30] sm:$0xff]  ;;  %s225_s23 = sshll.u32 %s304_s22, 4  ;;  %s226_s23 = int_to_ptr.vmem [resolvable:$true] %s225_s23 }
   0x7   :  { %264 = vmatprep.subr.bf16.mxu1 %v263_v17  ;;  %v269_v25 = vpack.c.bf16 %v127_v24, %v125_v23  ;;  %v234_v26 = vld [vmem:[%s397_s2] ss:$0 sm:$0xff]  ;;  %v133_v32 = vsub.s32 0, %v132_v31  ;;  %v137_v34 = vsub.s32 1, %v132_v31  ;;  %s277_s2 = scalar_lea.vmem %s226_s23, 256  ;;  %p282_p1 = scmp.lt.s32.totalorder %s226_s23, %s226_s23 }
   0x8   :  { %262 = vmatpush3.bf16.msra.mxu0 %v261_v10  ;;  %266 = vmatpush1.bf16.msra.mxu1 %v265_v21  ;;  %v129_v33 = vld [vmem:[%s399_s4] sm:$0x3]  ;;  %p278_p0 = scmp.ne.s32.totalorder %s226_s23, %s277_s2  ;;  %p283_p2 = scmp.lt.s32.totalorder %s277_s2, %s277_s2 }
   0x9   :  { %252 = vmatprep.subr.mxu0 %v302_v7  ;;  %268 = vmatprep.subr.bf16.mxu1 %v267_v22  ;;  %v134_v35 = vrot.slane %v129_v33, %v133_v32  ;;  %v138_v36 = vrot.slane %v129_v33, %v137_v34 }
   0xa   :  { %p284_p3 = por %p283_p2, %p282_p1 }
   0xc   :  { %253 = vmatpush3.msk.msra.mxu0 %vm46_vm2, %v34_v12  ;;  %270 = vmatpush1.bf16.msra.mxu1 %v269_v25  ;;  %p285_p4 = pnand %p284_p3, %p278_p0 }
   0xd   :  { %255 = vmatmul.mubr.msk.f32.vlgmr.msra.gmra.mrb[0].mxu0 %vm42_vm3, %v29_v13 }
  0xe0   :  { %v116_v27 = vpop.f32.mrb[0].mxu0 }
  0xe1   :  { %v117_v28 = vadd.f32 %v234_v26, %v116_v27  ;;  %v256_v29 = vpop.f32.mrb[1].mxu0 }
  0xe3   :  { %275 = vtanh.f32 %v117_v28 }
  0xed   :  { %v276_v30 = vpop.eup %275 }
  0xee   :  { %237 = vmatmul.mubr.msk.f32.vlgmr.msra.gmra.mrb[0].mxu1 %vm141_vm4, %v276_v30 }
 0x1c1   :  { %v211_v37 = vpop.f32.mrb[0].mxu1 }
 0x1c2   :  { %v212_v38 = vadd.f32 %v211_v37, %v134_v35  ;;  %v213_v39 = vpop.f32.mrb[1].mxu1 }
 0x1c3   :  { %v214_v40 = vadd.f32 %v213_v39, %v138_v36 }
 0x1c4   :  { %216 = vst [vmem:[#allocation2] sm:$0xff] %v212_v38 }
 0x1c5   :  { %218 = vst.msk [vmem:[#allocation2 + $0x8] sm:$0xff] %vm217_vm5, %v214_v40 }
 0x1c6   :  { %288 = shalt.err (!%p285_p4)
}
 0x1c7   :  { %s289_s25 = scalar_lea.hbm %s400_s5, 256 }
 0x1c8   :  { %p290_p5 = scmp.ne.s32.totalorder %s400_s5, %s289_s25  ;;  %p293_p6 = scmp.lt.u32.totalorder %s289_s25, %s400_s5 }
 0x1ca   :  { %p295_p7 = pnand %p293_p6, %p290_p5 }
 0x1cc   :  { %298 = shalt.err (!%p295_p7)
}
 0x1cd   :  { %228 = dma.vmem_to_hbm [thread:$0]  %s226_s23, 256, %s400_s5, [#allocation3]  }
 0x1ce   :  { %299 = dma.done.wait [#allocation3], 256  }
 0x1cf   :  { %300 = vsyncadd [#allocation3], 4294967040 }
 0x1d0   :  { %232 = vsyncpa [#allocation3], 1 }

</bundles_post_ra>
